<compile_context>
chip_gen: v6e
topology: v6e:2x2x1
jax: 0.10.0
libtpu: 0.0.40
codegen_flags: <defaults>
</compile_context>

<pallas_src>
import functools

import jax
import jax.numpy as jnp
from jax.experimental import pallas as pl
from jax.experimental.pallas import tpu as pltpu


def _round_up(x, m):
    return (x + m - 1) // m * m


def _choose_tbh(bh, w2, target_rows=512):
    """Pick how many (b, i) row-pairs each grid step processes."""
    tbh = max(1, min(bh, target_rows // max(w2, 1)))
    if bh > 1:
        # Guarantee >= 2 grid steps so v7x megacore can use both TensorCores.
        tbh = min(tbh, pl.cdiv(bh, 2))
    if (w2 % 8) and (tbh < bh):
        # Keep the output row-block a multiple of 8 sublanes.
        tbh = min(bh, _round_up(tbh, 8))
    return tbh


def _patch_merging_kernel(x_ref, we_ref, wo_ref, b_ref, o_ref, *, eps, inv_c4):
    # x_ref : (TBH, 2, W2, 2C)  -- [even-row | odd-row] x [even-col C | odd-col C]
    # we_ref: (2C, N)  bf16     -- gamma-folded weight rows for [x0 | x2]
    # wo_ref: (2C, N)  bf16     -- gamma-folded weight rows for [x1 | x3]
    # b_ref : (1, N)   f32      -- beta @ W
    # o_ref : (TBH*W2, N)
    tbh, _, w2, c2 = x_ref.shape
    rows = tbh * w2

    x = x_ref[...].astype(jnp.float32)                 # one HBM read of the tile
    e = x[:, 0, :, :].reshape(rows, c2)                # [x0 | x2] per merged row
    o = x[:, 1, :, :].reshape(rows, c2)                # [x1 | x3] per merged row

    # LayerNorm statistics over the full 4C feature (two-pass form: same op
    # count as sum/sum-sq but no E[x^2]-E[x]^2 cancellation).
    mean = (jnp.sum(e, axis=-1, keepdims=True)
            + jnp.sum(o, axis=-1, keepdims=True)) * inv_c4
    ec = e - mean
    oc = o - mean
    var = (jnp.sum(ec * ec, axis=-1, keepdims=True)
           + jnp.sum(oc * oc, axis=-1, keepdims=True)) * inv_c4
    rinv = jax.lax.rsqrt(var + eps)                    # EUP rsqrt

    en = (ec * rinv).astype(we_ref.dtype)              # bf16 into the MXU
    on = (oc * rinv).astype(wo_ref.dtype)
    acc = jnp.dot(en, we_ref[...], preferred_element_type=jnp.float32)
    acc = acc + jnp.dot(on, wo_ref[...], preferred_element_type=jnp.float32)
    o_ref[...] = (acc + b_ref[...]).astype(o_ref.dtype)


def patch_merging_forward(x, h, w, gamma, beta, w_t, *, eps=1e-5):
    """PatchMerging(dim).forward(x, h, w).

    x:      [B, L=h*w, C]  (f32 or bf16; bf16 halves the HBM read)
    gamma:  [4C] LayerNorm weight
    beta:   [4C] LayerNorm bias
    w_t:    [4C, 2C] reduction weight, pre-transposed from torch's [2C, 4C]
    returns [B, ceil(h/2)*ceil(w/2), 2C] float32
    """
    b, l, c = x.shape
    assert l == h * w
    c4, n_out = 4 * c, 2 * c
    assert w_t.shape == (c4, n_out)
    assert gamma.shape == (c4,) and beta.shape == (c4,)

    # F.pad(x, (0, 0, 0, w % 2, 0, h % 2)) -- rare path, materializes once.
    if (h % 2) or (w % 2):
        xv = x.reshape(b, h, w, c)
        xv = jnp.pad(xv, ((0, 0), (0, h % 2), (0, w % 2), (0, 0)))
        hp, wp = h + h % 2, w + w % 2
        x = xv.reshape(b, hp * wp, c)
    else:
        hp, wp = h, w
    h2, w2 = hp // 2, wp // 2
    bh = b * h2
    m = bh * w2

    # Fold the LayerNorm affine into the reduction weight (f32), split into the
    # even-row / odd-row halves matching the fused gather, then cast to bf16.
    w32 = w_t.astype(jnp.float32)
    wg = gamma.astype(jnp.float32)[:, None] * w32              # [4C, 2C]
    we = jnp.concatenate([wg[0:c], wg[2 * c:3 * c]], axis=0)   # rows for [x0 | x2]
    wo = jnp.concatenate([wg[c:2 * c], wg[3 * c:4 * c]], axis=0)  # rows for [x1 | x3]
    bias = (beta.astype(jnp.float32) @ w32).reshape(1, n_out)  # [1, 2C]

    # Lane-dense output: pad the output dim to 128 when 2C < 128 (avoids
    # masked vst.msk partial stores); sliced off after the kernel.
    n_pad = n_out if n_out >= 128 else 128
    if n_pad != n_out:
        we = jnp.pad(we, ((0, 0), (0, n_pad - n_out)))
        wo = jnp.pad(wo, ((0, 0), (0, n_pad - n_out)))
        bias = jnp.pad(bias, ((0, 0), (0, n_pad - n_out)))
    we = we.astype(jnp.bfloat16)
    wo = wo.astype(jnp.bfloat16)

    # Free (bit-layout-preserving) reshape: [B, L, C] -> [B*H2, 2, W2, 2C].
    # Index (p, r, j, s*C + c) == x[b, 2i+r, 2j+s, c] with p = b*H2 + i.
    xr = x.reshape(bh, 2, w2, 2 * c)

    tbh = _choose_tbh(bh, w2)
    grid = (pl.cdiv(bh, tbh),)          # ragged last tile handled by Pallas
    rows_per_step = tbh * w2

    kernel = functools.partial(_patch_merging_kernel, eps=eps, inv_c4=1.0 / c4)
    out = pl.pallas_call(
        kernel,
        out_shape=jax.ShapeDtypeStruct((m, n_pad), jnp.float32),
        grid_spec=pltpu.PrefetchScalarGridSpec(
            num_scalar_prefetch=0,
            grid=grid,
            in_specs=[
                pl.BlockSpec((tbh, 2, w2, 2 * c), lambda i: (i, 0, 0, 0)),
                pl.BlockSpec((2 * c, n_pad), lambda i: (0, 0)),   # resident
                pl.BlockSpec((2 * c, n_pad), lambda i: (0, 0)),   # resident
                pl.BlockSpec((1, n_pad), lambda i: (0, 0)),       # resident
            ],
            out_specs=pl.BlockSpec((rows_per_step, n_pad), lambda i: (i, 0)),
        ),
        compiler_params=pltpu.CompilerParams(
            dimension_semantics=("parallel",),      # row blocks split across TCs
            vmem_limit_bytes=64 * 1024 * 1024,
        ),
    )(xr, we, wo, bias)

    if n_pad != n_out:
        out = out[:, :n_out]
    return out.reshape(b, h2 * w2, n_out)


if __name__ == "__main__":
    key = jax.random.PRNGKey(0)
    B, H, W, C = 2, 16, 16, 32          # PatchMerging(dim=32), 16x16 grid -> L=256
    L = H * W
    EPS = 1e-5

    k1, k2, k3, k4 = jax.random.split(key, 4)
    x = jax.random.normal(k1, (B, L, C), dtype=jnp.float32)
    gamma = 1.0 + 0.1 * jax.random.normal(k2, (4 * C,), dtype=jnp.float32)
    beta = 0.1 * jax.random.normal(k3, (4 * C,), dtype=jnp.float32)
    # nn.Linear(4C, 2C, bias=False): torch stores [2C, 4C]; pass the transposed
    # [4C, 2C] f32 weight; the wrapper folds gamma in and casts to bf16.
    w_t = (jax.random.normal(k4, (4 * C, 2 * C), dtype=jnp.float32)
           * (1.0 / jnp.sqrt(4.0 * C)))

    out = patch_merging_forward(x, H, W, gamma, beta, w_t, eps=EPS)
    out = jax.block_until_ready(out)

    # Pure-f32 reference reproducing the PyTorch module's math.
    def ref_fn(x, gamma, beta, w_t):
        xv = x.reshape(B, H, W, C)
        x0 = xv[:, 0::2, 0::2, :]
        x1 = xv[:, 1::2, 0::2, :]
        x2 = xv[:, 0::2, 1::2, :]
        x3 = xv[:, 1::2, 1::2, :]
        xm = jnp.concatenate([x0, x1, x2, x3], -1).reshape(B, -1, 4 * C)
        mu = jnp.mean(xm, axis=-1, keepdims=True)
        xc = xm - mu
        var = jnp.mean(xc * xc, axis=-1, keepdims=True)
        xn = xc * jax.lax.rsqrt(var + EPS) * gamma + beta
        return jnp.einsum("blk,kn->bln", xn, w_t)

    ref = ref_fn(x, gamma, beta, w_t)
    assert out.shape == (B, (H // 2) * (W // 2), 2 * C), out.shape
    err = float(jnp.max(jnp.abs(out - ref)))
    assert jnp.allclose(out, ref, atol=3e-2, rtol=3e-2), err
    print("KERNEL_OK")
</pallas_src>

<mosaic_0001>
module attributes {stable_mosaic.version = 11 : i64} {
  func.func @_patch_merging_kernel(%arg0: i32, %arg1: memref<8x2x8x64xf32, #tpu.memory_space<vmem>>, %arg2: memref<64x128xbf16, #tpu.memory_space<vmem>>, %arg3: memref<64x128xbf16, #tpu.memory_space<vmem>>, %arg4: memref<1x128xf32, #tpu.memory_space<vmem>>, %arg5: memref<64x128xf32, #tpu.memory_space<vmem>>) attributes {dimension_semantics = [#tpu.dimension_semantics<parallel>], iteration_bounds = array<i64: 2>, scalar_prefetch = 0 : i64, scratch_operands = 0 : i64, tpu.core_type = #tpu.core_type<tc>, window_params = [{transform_indices = @transform_0, window_bounds = array<i64: 8, 2, 8, 64>}, {pipeline_mode = #tpu.pipeline_mode<synchronous>, transform_indices = @transform_1, window_bounds = array<i64: 64, 128>}, {pipeline_mode = #tpu.pipeline_mode<synchronous>, transform_indices = @transform_2, window_bounds = array<i64: 64, 128>}, {pipeline_mode = #tpu.pipeline_mode<synchronous>, transform_indices = @transform_3, window_bounds = array<i64: 1, 128>}, {transform_indices = @transform_4, window_bounds = array<i64: 64, 128>}]} {
    %c0 = arith.constant 0 : index
    %c0_0 = arith.constant 0 : index
    %c0_1 = arith.constant 0 : index
    %c0_2 = arith.constant 0 : index
    %0 = vector.load %arg1[%c0, %c0_0, %c0_1, %c0_2] : memref<8x2x8x64xf32, #tpu.memory_space<vmem>>, vector<8x2x8x64xf32>
    %1 = vector.extract_strided_slice %0 {offsets = [0, 0, 0, 0], sizes = [8, 1, 8, 64], strides = [1, 1, 1, 1]} : vector<8x2x8x64xf32> to vector<8x1x8x64xf32>
    %2 = vector.shape_cast %1 : vector<8x1x8x64xf32> to vector<8x8x64xf32>
    %3 = vector.shape_cast %2 : vector<8x8x64xf32> to vector<64x64xf32>
    %4 = vector.extract_strided_slice %0 {offsets = [0, 1, 0, 0], sizes = [8, 1, 8, 64], strides = [1, 1, 1, 1]} : vector<8x2x8x64xf32> to vector<8x1x8x64xf32>
    %5 = vector.shape_cast %4 : vector<8x1x8x64xf32> to vector<8x8x64xf32>
    %6 = vector.shape_cast %5 : vector<8x8x64xf32> to vector<64x64xf32>
    %cst = arith.constant dense<0.000000e+00> : vector<64xf32>
    %7 = vector.multi_reduction <add>, %3, %cst [1] : vector<64x64xf32> to vector<64xf32>
    %8 = vector.shape_cast %7 : vector<64xf32> to vector<64x1xf32>
    %cst_3 = arith.constant dense<0.000000e+00> : vector<64xf32>
    %9 = vector.multi_reduction <add>, %6, %cst_3 [1] : vector<64x64xf32> to vector<64xf32>
    %10 = vector.shape_cast %9 : vector<64xf32> to vector<64x1xf32>
    %11 = arith.addf %8, %10 : vector<64x1xf32>
    %cst_4 = arith.constant 7.812500e-03 : f32
    %12 = vector.broadcast %cst_4 : f32 to vector<64x1xf32>
    %13 = arith.mulf %11, %12 : vector<64x1xf32>
    %14 = vector.broadcast %13 : vector<64x1xf32> to vector<64x64xf32>
    %15 = arith.subf %3, %14 : vector<64x64xf32>
    %16 = vector.broadcast %13 : vector<64x1xf32> to vector<64x64xf32>
    %17 = arith.subf %6, %16 : vector<64x64xf32>
    %18 = arith.mulf %15, %15 : vector<64x64xf32>
    %cst_5 = arith.constant dense<0.000000e+00> : vector<64xf32>
    %19 = vector.multi_reduction <add>, %18, %cst_5 [1] : vector<64x64xf32> to vector<64xf32>
    %20 = vector.shape_cast %19 : vector<64xf32> to vector<64x1xf32>
    %21 = arith.mulf %17, %17 : vector<64x64xf32>
    %cst_6 = arith.constant dense<0.000000e+00> : vector<64xf32>
    %22 = vector.multi_reduction <add>, %21, %cst_6 [1] : vector<64x64xf32> to vector<64xf32>
    %23 = vector.shape_cast %22 : vector<64xf32> to vector<64x1xf32>
    %24 = arith.addf %20, %23 : vector<64x1xf32>
    %cst_7 = arith.constant 7.812500e-03 : f32
    %25 = vector.broadcast %cst_7 : f32 to vector<64x1xf32>
    %26 = arith.mulf %24, %25 : vector<64x1xf32>
    %cst_8 = arith.constant 9.99999974E-6 : f32
    %27 = vector.broadcast %cst_8 : f32 to vector<64x1xf32>
    %28 = arith.addf %26, %27 : vector<64x1xf32>
    %29 = math.rsqrt %28 : vector<64x1xf32>
    %30 = vector.broadcast %29 : vector<64x1xf32> to vector<64x64xf32>
    %31 = arith.mulf %15, %30 : vector<64x64xf32>
    %32 = arith.truncf %31 : vector<64x64xf32> to vector<64x64xbf16>
    %33 = vector.broadcast %29 : vector<64x1xf32> to vector<64x64xf32>
    %34 = arith.mulf %17, %33 : vector<64x64xf32>
    %35 = arith.truncf %34 : vector<64x64xf32> to vector<64x64xbf16>
    %c0_9 = arith.constant 0 : index
    %c0_10 = arith.constant 0 : index
    %36 = vector.load %arg2[%c0_9, %c0_10] : memref<64x128xbf16, #tpu.memory_space<vmem>>, vector<64x128xbf16>
    %cst_11 = arith.constant dense<0.000000e+00> : vector<64x128xf32>
    %37 = tpu.matmul %32, %36, %cst_11 {dimension_numbers = #tpu.dot_dimension_numbers<[1], [0], [0], [1], [0, 0, 1, 1], [], []>} : vector<64x64xbf16>, vector<64x128xbf16>, vector<64x128xf32> -> vector<64x128xf32>
    %c0_12 = arith.constant 0 : index
    %c0_13 = arith.constant 0 : index
    %38 = vector.load %arg3[%c0_12, %c0_13] : memref<64x128xbf16, #tpu.memory_space<vmem>>, vector<64x128xbf16>
    %cst_14 = arith.constant dense<0.000000e+00> : vector<64x128xf32>
    %39 = tpu.matmul %35, %38, %cst_14 {dimension_numbers = #tpu.dot_dimension_numbers<[1], [0], [0], [1], [0, 0, 1, 1], [], []>} : vector<64x64xbf16>, vector<64x128xbf16>, vector<64x128xf32> -> vector<64x128xf32>
    %40 = arith.addf %37, %39 : vector<64x128xf32>
    %c0_15 = arith.constant 0 : index
    %c0_16 = arith.constant 0 : index
    %41 = vector.load %arg4[%c0_15, %c0_16] : memref<1x128xf32, #tpu.memory_space<vmem>>, vector<1x128xf32>
    %42 = vector.broadcast %41 : vector<1x128xf32> to vector<64x128xf32>
    %43 = arith.addf %40, %42 : vector<64x128xf32>
    %c0_17 = arith.constant 0 : index
    %c0_18 = arith.constant 0 : index
    %44 = vector.load %arg5[%c0_17, %c0_18] : memref<64x128xf32, #tpu.memory_space<vmem>>, vector<64x128xf32>
    tpu.vector_store %arg5[%c0_17, %c0_18], %43 {strides = array<i32>} : memref<64x128xf32, #tpu.memory_space<vmem>>, vector<64x128xf32>,
    return
  }
  func.func @transform_0(%arg0: i32) -> (i32, i32, i32, i32) {
    %c0_i32 = arith.constant 0 : i32
    %c0_i32_0 = arith.constant 0 : i32
    %c0_i32_1 = arith.constant 0 : i32
    %c0_i32_2 = arith.constant 0 : i32
    return %arg0, %c0_i32, %c0_i32_0, %c0_i32_1 : i32, i32, i32, i32
  }
  func.func @transform_1(%arg0: i32) -> (i32, i32) {
    %c0_i32 = arith.constant 0 : i32
    %c0_i32_0 = arith.constant 0 : i32
    %c0_i32_1 = arith.constant 0 : i32
    return %c0_i32, %c0_i32_0 : i32, i32
  }
  func.func @transform_2(%arg0: i32) -> (i32, i32) {
    %c0_i32 = arith.constant 0 : i32
    %c0_i32_0 = arith.constant 0 : i32
    %c0_i32_1 = arith.constant 0 : i32
    return %c0_i32, %c0_i32_0 : i32, i32
  }
  func.func @transform_3(%arg0: i32) -> (i32, i32) {
    %c0_i32 = arith.constant 0 : i32
    %c0_i32_0 = arith.constant 0 : i32
    %c0_i32_1 = arith.constant 0 : i32
    return %c0_i32, %c0_i32_0 : i32, i32
  }
  func.func @transform_4(%arg0: i32) -> (i32, i32) {
    %c0_i32 = arith.constant 0 : i32
    %c0_i32_0 = arith.constant 0 : i32
    return %arg0, %c0_i32 : i32, i32
  }
}

</mosaic_0001>

<bundles_post_ra>
// kernel: tpu_custom_call.1
= control target key start
LH: loop header
LB: loop body
LE: loop exit
PB: predicated region body
PF: predicated region fallthrough
CT: control target
= control target key end

     0   :  { %9 = vsyncpa [#allocation3], 0  ;;  %s1571_s0 = inlined_call_operand.hbm [shape: f32[16,2,8,64], index: 0, kind: input, shape index: {}]   ;;  %s1572_s1 = inlined_call_operand.hbm [shape: bf16[64,128], index: 1, kind: input, shape index: {}]   ;;  %s1573_s2 = inlined_call_operand.hbm [shape: bf16[64,128], index: 2, kind: input, shape index: {}]   ;;  %s1574_s3 = inlined_call_operand.vmem [shape: f32[1,128], index: 3, kind: input, shape index: {}]   ;;  %s1575_s4 = inlined_call_operand.hbm [shape: f32[128,128], index: 4, kind: output, shape index: {}]  }
   0x1   :  { %11 = vsyncpa [#allocation3 + $0x1], 0 }
   0x2   :  { %12 = vsyncpa [#allocation6], 0 }
   0x3   :  { %13 = vsyncpa [#allocation4], 0 }
   0x4   :  { %15 = vsyncpa [#allocation4 + $0x1], 0  ;;  %s1182_s15 = smov 0   ;;  %s1184_s16 = smov 0  }
   0x5   :  { %s1186_s17 = smov 0   ;;  %s1188_s18 = smov 0  }
   0x6 LB: > { %s1203_s19 = sadd.s32 4294967295, %s1145_s18   ;;  %s813_s20 = sadd.s32 4294967294, %s1145_s18   ;;  %s1145_s18 = sphi %s1188_s18, %s1597_s18   ;;  %s1141_s17 = sphi %s1186_s17, %s1596_s17   ;;  %s1137_s16 = sphi %s1184_s16, %s1595_s16   ;;  %s1133_s15 = sphi %s1182_s15, %s1594_s15  }
   0x7   : > { %p41_p0 = scmp.ne.s32.totalorder %s1137_s16, %s1133_s15  ;;  %p1576_p1 = scmp.eq.s32.totalorder %s1203_s19, 0 }
   0x8   : > { %p134_p3 = scmp.eq.s32.totalorder %s813_s20, 1  ;;  %p814_p5 = scmp.ge.s32.totalorder %s1145_s18, 1 }
   0x9   : > { %p1212_p4 = por %p1576_p1, %p41_p0  ;;  %p141_p7 = scmp.lt.s32.totalorder %s1145_s18, 3 }
   0xa   : > { %p1217_p6 = por %p134_p3, %p41_p0  ;;  %s1147_s24 = smov [#allocation5]  }
   0xb   : > { %s1580_s21 = scalar_select %p1212_p4, 1, 0 }
   0xc   : > { %s1581_s22 = scalar_select %p1217_p6, 1, 0 }
   0xd   : > { %p1222_p8 = pnand %p814_p5, %p141_p7  ;;  %s153_s25 = sshll.u32 %s1147_s24, 4  ;;  %s154_s25 = int_to_ptr.vmem [resolvable:$true] %s153_s25 }
   0xe   : > { %s1148_s27 = smov [#allocation7]   ;;  %s1008_s29 = scalar_lea.vmem %s154_s25, 512 }
   0xf   : > { %s1582_s23 = scalar_select %p1222_p8, 1, 0 }
  0x10   : > { %p912_p9 = pneg %p1222_p8  ;;  %s166_s28 = sshll.u32 %s1148_s27, 4  ;;  %s167_s28 = int_to_ptr.vmem [resolvable:$true] %s166_s28 }
  0x11   : > { %p1009_p13 = scmp.ne.s32.totalorder %s154_s25, %s1008_s29  ;;  %p1016_p5 = scmp.lt.s32.totalorder %s154_s25, %s154_s25 }
  0x12   : > { %p1231_p11 = pnand %p912_p9, %p1576_p1  ;;  %p1017_p7 = scmp.lt.s32.totalorder %s1008_s29, %s1008_s29 }
  0x14   : > { %p999_p12 = pneg %p1231_p11  ;;  %p1018_p10 = por %p1017_p7, %p1016_p5 }
  0x16   : > { %p1011_p0 = pnand %p1009_p13, %p999_p12 }
  0x18   : > { %p1012_p3 = pneg %p1011_p0 }
  0x1a   : > { %p1019_p9 = pnand %p1018_p10, %p1012_p3 }
  0x1c   : > { %1022 = shalt.err (!%p1019_p9)
}
  0x1d   : > { %s1149_s30 = smov 64   ;;  %s1150_s5 = smov 4  }
  0x1e   : > { %915 = dma.hbm_to_vmem [thread:$0]  (!%p1231_p11), %s1572_s1, 512, %s154_s25, [#allocation6], %s1149_s30, %s1149_s30, %s1150_s5  }
  0x1f   : > { %s1034_s8 = scalar_lea.vmem %s167_s28, 512  ;;  %p1042_p2 = scmp.lt.s32.totalorder %s167_s28, %s167_s28 }
  0x20   : > { %p1035_p1 = scmp.ne.s32.totalorder %s167_s28, %s1034_s8  ;;  %p1043_p6 = scmp.lt.s32.totalorder %s1034_s8, %s1034_s8 }
  0x22   : > { %p1037_p13 = pnand %p1035_p1, %p999_p12  ;;  %p1044_p5 = por %p1043_p6, %p1042_p2 }
  0x24   : > { %p1038_p0 = pneg %p1037_p13 }
  0x26   : > { %p1045_p10 = pnand %p1044_p5, %p1038_p0 }
  0x28   : > { %1048 = shalt.err (!%p1045_p10)
}
  0x29   : > { %918 = dma.hbm_to_vmem [thread:$0]  (!%p1231_p11), %s1573_s2, 512, %s167_s28, [#allocation6], %s1149_s30, %s1149_s30, %s1150_s5  }
  0x2a   : > { %s1254_s11 = sadd.s32 1, %s1145_s18   ;;  %s28_s12 = sadd.s32 1, %s1141_s17 }
  0x2b   : > { %s25_s13 = ssub.s32 %s1145_s18, %s1254_s11  ;;  %p35_p1 = scmp.ne.s32.totalorder %s1141_s17, %s1137_s16 }
  0x2c   : > { %p26_p2 = scmp.eq.s32.totalorder %s25_s13, 0  ;;  %p36_p6 = scmp.eq.s32.totalorder %s1145_s18, 0 }
  0x2d   : > { %p1584_p12 = scmp.eq.s32.totalorder %s1203_s19, 1  ;;  %p929_p7 = scmp.lt.s32.totalorder %s1145_s18, 2 }
  0x2e   : > { %s1270_s20 = scalar_select %p26_p2, %s1141_s17, %s28_s12  }
  0x2f   : > { %p1264_p3 = por %p1584_p12, %p35_p1  ;;  %p37_p9 = por %p36_p6, %p35_p1 }
  0x30   : > { %s183_s24 = sand.u32 1, %s1141_s17   ;;  %s850_s26 = sshll.u32 %s1145_s18, 11 }
  0x31   : > { %s1585_s14 = scalar_select %p1264_p3, 1, 0 }
  0x32   : > { %s818_s25 = sshll.u32 %s183_s24, 7  ;;  %s1277_s29 = scalar_lea.hbm %s1571_s0, %s850_s26 }
  0x33   : > { %s187_s30 = scalar_lea.vmem [#allocation2], %s818_s25  ;;  %p1281_p11 = pnand %p929_p7, %p37_p9 }
  0x34   : > { %s195_s5 = sshll.u32 %s187_s30, 4  ;;  %s1285_s7 = scalar_lea.sflag [#allocation3], %s183_s24  ;;  %s1279_s5 = int_to_ptr.vmem [resolvable:$true] %s195_s5 }
  0x35   : > { %s1049_s8 = scalar_lea.hbm %s1277_s29, 2048  ;;  %p1051_p0 = pneg %p1281_p11 }
  0x36   : > { %p1050_p13 = scmp.ne.s32.totalorder %s1277_s29, %s1049_s8  ;;  %s1054_s12 = scalar_lea.hbm %s1571_s0, 4096 }
  0x37   : > { %p1055_p1 = scmp.lt.s32.totalorder %s1277_s29, %s1571_s0  ;;  %p1056_p2 = scmp.lt.s32.totalorder %s1054_s12, %s1049_s8 }
  0x38   : > { %p1052_p5 = pnand %p1051_p0, %p1050_p13 }
  0x39   : > { %p1057_p6 = por %p1056_p2, %p1055_p1 }
  0x3a   : > { %p1053_p10 = pneg %p1052_p5 }
  0x3c   : > { %p1058_p12 = pnand %p1057_p6, %p1053_p10 }
  0x3e   : > { %1061 = shalt.err (!%p1058_p12)
}
  0x3f   : > { %s1062_s24 = scalar_lea.vmem %s1279_s5, 2048  ;;  %s1151_s26 = smov [#allocation2]  }
  0x40   : > { %p1063_p7 = scmp.ne.s32.totalorder %s1279_s5, %s1062_s24  ;;  %s1067_s27 = sshll.u32 %s1151_s26, 4  ;;  %s1068_s27 = int_to_ptr.vmem [resolvable:$false] %s1067_s27 }
  0x41   : > { %s1069_s28 = scalar_lea.vmem %s1068_s27, 4096  ;;  %p1070_p5 = scmp.lt.s32.totalorder %s1279_s5, %s1068_s27 }
  0x42   : > { %p1065_p9 = pnand %p1063_p7, %p1051_p0  ;;  %p1071_p3 = scmp.lt.s32.totalorder %s1069_s28, %s1062_s24 }
  0x44   : > { %p1066_p13 = pneg %p1065_p9  ;;  %p1072_p4 = por %p1071_p3, %p1070_p5 }
  0x46   : > { %p1073_p8 = pnand %p1072_p4, %p1066_p13 }
  0x48   : > { %1076 = shalt.err (!%p1073_p8)
}
  0x49   : > { %s1152_s30 = smov 128   ;;  %s1153_s8 = smov 8  }
  0x4a   : > { %922 = dma.hbm_to_vmem [thread:$0]  (!%p1281_p11), %s1277_s29, 2048, %s1279_s5, %s1285_s7, %s1152_s30, %s1152_s30, %s1153_s8  }
  0x4b   : > { %p1587_p0 = scmp.ne.s32.totalorder %s1582_s23, 0 }
  0x4c   : > { %s1309_s9 = sand.u32 (!%p1587_p0), 1, %s1137_s16   ;;  %p1588_p4 = scmp.ne.s32.totalorder (!%p1587_p0), %s1580_s21, 0 }
  0x4d   : > { %207 = sbr.rel (%p1587_p0) target bundleno = 647 (0x287), region = 36  ;;  %s823_s10 = sshll.u32 (!%p1587_p0), %s1309_s9, 7 }
  0x4e   : > { %s210_s12 = scalar_lea.sflag (!%p1587_p0), [#allocation3], %s1309_s9  ;;  %s1313_s13 = scalar_lea.vmem (!%p1587_p0), [#allocation2], %s823_s10 }
  0x52   : > { %1120 = dma.done.wait (%p1588_p4), %s210_s12, 2048  }
  0x53   : > { %1122 = vsyncadd (%p1588_p4), %s210_s12, 4294965248  ;;  %p1589_p8 = scmp.eq.s32.totalorder %s1203_s19, 0 }
  0x55   : > { %1124 = dma.done.wait (%p1589_p8), [#allocation6], 1024   ;;  %p1590_p3 = pmov %p1589_p8 }
  0x56   : > { %vm265_vm0 = vcmask 523264   ;;  %v250_v0 = vld [vmem:[%s1313_s13 + $0x8] sm:$0xff]  ;;  %v249_v1 = vld [vmem:[%s1313_s13] sm:$0xff]  ;;  %v252_v2 = vld [vmem:[%s1313_s13 + $0x18] sm:$0xff]  ;;  %s826_s21 = sshll.u32 %s1309_s9, 6  ;;  %s851_s7 = sshll.u32 %s1203_s19, 10 }
  0x57   : > { %1126 = vsyncadd (%p1590_p3), [#allocation6], 4294966272  ;;  %v290_v3 = vsel %vm265_vm0, %v250_v0, 0.0  ;;  %v266_v4 = vsel %vm265_vm0, %v249_v1, 0.0  ;;  %v251_v5 = vld [vmem:[%s1313_s13 + $0x10] sm:$0xff]  ;;  %v293_v7 = vsel %vm265_vm0, %v252_v2, 0.0  ;;  %s1526_s26 = scalar_lea.hbm %s1575_s4, %s851_s7 }
  0x58   : > { %291 = vadd.xlane.f32.xlu1 %v290_v3  ;;  %267 = vadd.xlane.f32.xlu0 %v266_v4  ;;  %v1330_v6 = vld [vmem:[%s1313_s13 + $0x30] sm:$0xff]  ;;  %v269_v8 = vsel %vm265_vm0, %v251_v5, 0.0  ;;  %v1335_v9 = vld [vmem:[%s1313_s13 + $0x20] sm:$0xff]  ;;  %v1342_v12 = vld [vmem:[%s1313_s13 + $0x38] sm:$0xff]  ;;  %s1511_s5 = scalar_lea.vmem [#allocation8], %s826_s21  ;;  %s708_s27 = scalar_lea.sflag [#allocation4], %s1309_s9 }
  0x59   : > { %v275_v10 = vsel %vm265_vm0, %v1330_v6, 0.0  ;;  %v272_v11 = vsel %vm265_vm0, %v1335_v9, 0.0  ;;  %v1345_v13 = vld [vmem:[%s1313_s13 + $0x28] sm:$0xff]  ;;  %v299_v14 = vsel %vm265_vm0, %v1342_v12, 0.0  ;;  %v1352_v16 = vld [vmem:[%s1313_s13 + $0x50] sm:$0xff]  ;;  %v1355_v17 = vld [vmem:[%s1313_s13 + $0x40] sm:$0xff] }
  0x5a   : > { %v296_v15 = vsel %vm265_vm0, %v1345_v13, 0.0  ;;  %v281_v18 = vsel %vm265_vm0, %v1352_v16, 0.0  ;;  %v278_v19 = vsel %vm265_vm0, %v1355_v17, 0.0  ;;  %v1362_v20 = vld [vmem:[%s1313_s13 + $0x58] sm:$0xff]  ;;  %v1365_v21 = vld [vmem:[%s1313_s13 + $0x48] sm:$0xff]  ;;  %v1372_v24 = vld [vmem:[%s1313_s13 + $0x70] sm:$0xff] }
  0x5b   : > { %v305_v22 = vsel %vm265_vm0, %v1362_v20, 0.0  ;;  %v302_v23 = vsel %vm265_vm0, %v1365_v21, 0.0  ;;  %v1375_v25 = vld [vmem:[%s1313_s13 + $0x60] sm:$0xff]  ;;  %v287_v26 = vsel %vm265_vm0, %v1372_v24, 0.0  ;;  %v1382_v28 = vld [vmem:[%s1313_s13 + $0x78] sm:$0xff]  ;;  %v1385_v29 = vld [vmem:[%s1313_s13 + $0x68] sm:$0xff] }
  0x5c   : > { %294 = vadd.xlane.f32.xlu1 %v293_v7  ;;  %270 = vadd.xlane.f32.xlu0 %v269_v8  ;;  %v284_v27 = vsel %vm265_vm0, %v1375_v25, 0.0  ;;  %v311_v30 = vsel %vm265_vm0, %v1382_v28, 0.0  ;;  %v308_v31 = vsel %vm265_vm0, %v1385_v29, 0.0  ;;  %s721_s6 = sshll.u32 %s1511_s5, 4  ;;  %p1591_p10 = scmp.ne.s32.totalorder %s1585_s14, 0  ;;  %s1520_s6 = int_to_ptr.vmem [resolvable:$true] %s721_s6 }
  0x5d   : > { %s1077_s19 = scalar_lea.vmem %s1520_s6, 1024  ;;  %s1154_s28 = smov [#allocation8]  }
  0x5e   : > { %p1078_p11 = scmp.ne.s32.totalorder %s1520_s6, %s1077_s19  ;;  %s1081_s30 = sshll.u32 %s1154_s28, 4  ;;  %s1082_s30 = int_to_ptr.vmem [resolvable:$false] %s1081_s30 }
  0x5f   : > { %s1083_s8 = scalar_lea.vmem %s1082_s30, 2048  ;;  %p1084_p6 = scmp.lt.s32.totalorder %s1520_s6, %s1082_s30 }
  0x60   : > { %276 = vadd.xlane.f32.xlu1 %v275_v10  ;;  %273 = vadd.xlane.f32.xlu0 %v272_v11  ;;  %p1079_p1 = pnand %p1078_p11, %p1591_p10  ;;  %p1085_p12 = scmp.lt.s32.totalorder %s1083_s8, %s1077_s19 }
  0x62   : > { %p1080_p2 = pneg %p1079_p1  ;;  %p1086_p7 = por %p1085_p12, %p1084_p6 }
  0x64   : > { %300 = vadd.xlane.f32.xlu1 %v299_v14  ;;  %297 = vadd.xlane.f32.xlu0 %v296_v15  ;;  %p1087_p9 = pnand %p1086_p7, %p1080_p2 }
  0x68   : > { %282 = vadd.xlane.f32.xlu1 %v281_v18  ;;  %279 = vadd.xlane.f32.xlu0 %v278_v19 }
  0x6c   : > { %306 = vadd.xlane.f32.xlu1 %v305_v22  ;;  %303 = vadd.xlane.f32.xlu0 %v302_v23 }
  0x70   : > { %288 = vadd.xlane.f32.xlu1 %v287_v26  ;;  %285 = vadd.xlane.f32.xlu0 %v284_v27 }
  0x74   : > { %312 = vadd.xlane.f32.xlu1 %v311_v30  ;;  %309 = vadd.xlane.f32.xlu0 %v308_v31 }
  0xe1   : > { %v292_v32 = vpop.xlane.xlu1 %291  ;;  %v268_v33 = vpop.xlane.xlu0 %267 }
  0xe2   : > { %v314_v34 = vadd.f32 %v292_v32, %v268_v33 }
  0xe4   : > { %v322_v35 = vmul.f32 0.0078125, %v314_v34 }
  0xe5   : > { %v295_v36 = vpop.xlane.xlu1 %294  ;;  %v271_v37 = vpop.xlane.xlu0 %270 }
  0xe6   : > { %v1391_v38 = vsub.f32 %v249_v1, %v322_v35  ;;  %v1393_v39 = vsub.f32 %v250_v0, %v322_v35  ;;  %v315_v40 = vadd.f32 %v295_v36, %v271_v37 }
  0xe8   : > { %v323_v41 = vmul.f32 0.0078125, %v315_v40  ;;  %v346_v42 = vmul.f32 %v1391_v38, %v1391_v38  ;;  %v378_v48 = vmul.f32 %v1393_v39, %v1393_v39 }
  0xe9   : > { %v277_v43 = vpop.xlane.xlu1 %276  ;;  %v274_v44 = vpop.xlane.xlu0 %273 }
  0xea   : > { %v1397_v45 = vsub.f32 %v251_v5, %v323_v41  ;;  %v1399_v46 = vsub.f32 %v252_v2, %v323_v41  ;;  %v354_v47 = vsel %vm265_vm0, %v346_v42, 0.0  ;;  %v386_v55 = vsel %vm265_vm0, %v378_v48, 0.0 }
  0xeb   : > { %355 = vadd.xlane.f32.xlu0 %v354_v47 }
  0xec   : > { %v347_v49 = vmul.f32 %v1397_v45, %v1397_v45  ;;  %v379_v52 = vmul.f32 %v1399_v46, %v1399_v46 }
  0xed   : > { %v301_v50 = vpop.xlane.xlu1 %300  ;;  %v298_v51 = vpop.xlane.xlu0 %297 }
  0xee   : > { %v317_v53 = vadd.f32 %v301_v50, %v277_v43  ;;  %v316_v54 = vadd.f32 %v298_v51, %v274_v44  ;;  %v357_v56 = vsel %vm265_vm0, %v347_v49, 0.0  ;;  %v389_v61 = vsel %vm265_vm0, %v379_v52, 0.0  ;;  %v973_v52 = vld [vmem:[#allocation7 + $0x18] sm:$0xff]  }
  0xef   : > { %387 = vadd.xlane.f32.xlu0 %v386_v55  ;;  %358 = vadd.xlane.f32.xlu1 %v357_v56  ;;  %v976_v55 = vld [vmem:[#allocation5 + $0x10] sm:$0xff]   ;;  %v977_v56 = vld [vmem:[#allocation7 + $0x8] sm:$0xff]  }
  0xf0   : > { %v325_v57 = vmul.f32 0.0078125, %v317_v53  ;;  %v324_v58 = vmul.f32 0.0078125, %v316_v54  ;;  %v974_v53 = vld [vmem:[#allocation5 + $0x18] sm:$0xff]   ;;  %868 = vmatprep.subr.bf16.mxu0 %v973_v52  ;;  %v975_v54 = vld [vmem:[#allocation7 + $0x10] sm:$0xff]  }
  0xf1   : > { %v283_v59 = vpop.xlane.xlu1 %282  ;;  %v280_v60 = vpop.xlane.xlu0 %279  ;;  %884 = vmatprep.subr.bf16.mxu1 %v974_v53  ;;  %869 = vmatpush3.bf16.msra.mxu0 %v973_v52 }
  0xf2   : > { %v1412_v62 = vsub.f32 %v1330_v6, %v325_v57  ;;  %v1415_v63 = vsub.f32 %v1342_v12, %v325_v57  ;;  %v1418_v0 = vsub.f32 %v1335_v9, %v324_v58  ;;  %v1421_v1 = vsub.f32 %v1345_v13, %v324_v58  ;;  %885 = vmatpush3.bf16.msra.mxu1 %v974_v53  ;;  %v978_v57 = vld [vmem:[#allocation5 + $0x8] sm:$0xff]   ;;  %v979_v58 = vld [vmem:[#allocation7] sm:$0xff]  }
  0xf3   : > { %390 = vadd.xlane.f32.xlu1 %v389_v61  ;;  %870 = vmatprep.subr.bf16.mxu0 %v975_v54 }
  0xf4   : > { %v349_v2 = vmul.f32 %v1412_v62, %v1412_v62  ;;  %v348_v3 = vmul.f32 %v1418_v0, %v1418_v0  ;;  %v381_v6 = vmul.f32 %v1415_v63, %v1415_v63  ;;  %v380_v7 = vmul.f32 %v1421_v1, %v1421_v1  ;;  %886 = vmatprep.subr.bf16.mxu1 %v976_v55 }
  0xf5   : > { %v307_v4 = vpop.xlane.xlu1 %306  ;;  %v304_v5 = vpop.xlane.xlu0 %303  ;;  %871 = vmatpush3.bf16.msra.mxu0 %v975_v54 }
  0xf6   : > { %v319_v8 = vadd.f32 %v307_v4, %v283_v59  ;;  %v318_v9 = vadd.f32 %v304_v5, %v280_v60  ;;  %v363_v10 = vsel %vm265_vm0, %v349_v2, 0.0  ;;  %v360_v11 = vsel %vm265_vm0, %v348_v3, 0.0  ;;  %887 = vmatpush3.bf16.msra.mxu1 %v976_v55  ;;  %872 = vmatprep.subr.bf16.mxu0 %v977_v56  ;;  %v980_v59 = vld [vmem:[#allocation5] sm:$0xff]  }
  0xf7   : > { %364 = vadd.xlane.f32.xlu1 %v363_v10  ;;  %361 = vadd.xlane.f32.xlu0 %v360_v11  ;;  %v395_v18 = vsel %vm265_vm0, %v381_v6, 0.0  ;;  %v392_v19 = vsel %vm265_vm0, %v380_v7, 0.0 }
  0xf8   : > { %v327_v12 = vmul.f32 0.0078125, %v319_v8  ;;  %v326_v13 = vmul.f32 0.0078125, %v318_v9  ;;  %888 = vmatprep.subr.bf16.mxu1 %v978_v57 }
  0xf9   : > { %v289_v14 = vpop.xlane.xlu1 %288  ;;  %v286_v15 = vpop.xlane.xlu0 %285  ;;  %873 = vmatpush3.bf16.msra.mxu0 %v977_v56 }
  0xfa   : > { %v1436_v22 = vsub.f32 %v1352_v16, %v327_v12  ;;  %v1439_v23 = vsub.f32 %v1362_v20, %v327_v12  ;;  %v1442_v26 = vsub.f32 %v1355_v17, %v326_v13  ;;  %v1445_v27 = vsub.f32 %v1365_v21, %v326_v13  ;;  %889 = vmatpush3.bf16.msra.mxu1 %v978_v57 }
  0xfb   : > { %396 = vadd.xlane.f32.xlu1 %v395_v18  ;;  %393 = vadd.xlane.f32.xlu0 %v392_v19 }
  0xfc   : > { %v351_v30 = vmul.f32 %v1436_v22, %v1436_v22  ;;  %v350_v31 = vmul.f32 %v1442_v26, %v1442_v26  ;;  %v383_v20 = vmul.f32 %v1439_v23, %v1439_v23  ;;  %v382_v17 = vmul.f32 %v1445_v27, %v1445_v27  ;;  %874 = vmatprep.subr.bf16.mxu0 %v979_v58 }
  0xfd   : > { %v313_v32 = vpop.xlane.xlu1 %312  ;;  %v310_v16 = vpop.xlane.xlu0 %309  ;;  %890 = vmatprep.subr.bf16.mxu1 %v980_v59  ;;  %875 = vmatpush3.bf16.msra.mxu0 %v979_v58 }
  0xfe   : > { %v321_v33 = vadd.f32 %v313_v32, %v289_v14  ;;  %v320_v34 = vadd.f32 %v310_v16, %v286_v15  ;;  %v369_v21 = vsel %vm265_vm0, %v351_v30, 0.0  ;;  %v366_v35 = vsel %vm265_vm0, %v350_v31, 0.0  ;;  %891 = vmatpush3.bf16.msra.mxu1 %v980_v59 }
  0xff   : > { %370 = vadd.xlane.f32.xlu1 %v369_v21  ;;  %367 = vadd.xlane.f32.xlu0 %v366_v35  ;;  %v401_v40 = vsel %vm265_vm0, %v383_v20, 0.0  ;;  %v398_v41 = vsel %vm265_vm0, %v382_v17, 0.0 }
 0x100   : > { %v329_v36 = vmul.f32 0.0078125, %v321_v33  ;;  %v328_v37 = vmul.f32 0.0078125, %v320_v34 }
 0x102   : > { %v1460_v42 = vsub.f32 %v1372_v24, %v329_v36  ;;  %v1463_v43 = vsub.f32 %v1382_v28, %v329_v36  ;;  %v1466_v44 = vsub.f32 %v1375_v25, %v328_v37  ;;  %v1469_v47 = vsub.f32 %v1385_v29, %v328_v37 }
 0x103   : > { %402 = vadd.xlane.f32.xlu1 %v401_v40  ;;  %399 = vadd.xlane.f32.xlu0 %v398_v41 }
 0x104   : > { %v353_v48 = vmul.f32 %v1460_v42, %v1460_v42  ;;  %v352_v49 = vmul.f32 %v1466_v44, %v1466_v44  ;;  %v385_v28 = vmul.f32 %v1463_v43, %v1463_v43  ;;  %v384_v25 = vmul.f32 %v1469_v47, %v1469_v47 }
 0x106   : > { %v375_v24 = vsel %vm265_vm0, %v353_v48, 0.0  ;;  %v372_v50 = vsel %vm265_vm0, %v352_v49, 0.0  ;;  %v407_v29 = vsel %vm265_vm0, %v385_v28, 0.0  ;;  %v404_v51 = vsel %vm265_vm0, %v384_v25, 0.0 }
 0x107   : > { %376 = vadd.xlane.f32.xlu1 %v375_v24  ;;  %373 = vadd.xlane.f32.xlu0 %v372_v50 }
 0x10b   : > { %408 = vadd.xlane.f32.xlu1 %v407_v29  ;;  %405 = vadd.xlane.f32.xlu0 %v404_v51 }
 0x174   : > { %v356_v60 = vpop.xlane.xlu0 %355 }
 0x178   : > { %v359_v61 = vpop.xlane.xlu1 %358  ;;  %v388_v2 = vpop.xlane.xlu0 %387 }
 0x179   : > { %v410_v3 = vadd.f32 %v388_v2, %v356_v60 }
 0x17b   : > { %v418_v4 = vmul.f32 0.0078125, %v410_v3 }
 0x17c   : > { %v391_v5 = vpop.xlane.xlu1 %390 }
 0x17d   : > { %v426_v6 = vadd.f32 1e-05, %v418_v4  ;;  %v411_v7 = vadd.f32 %v391_v5, %v359_v61 }
 0x17f   : > { %v419_v8 = vmul.f32 0.0078125, %v411_v7  ;;  %981 = vrsqrt.f32 %v426_v6 }
 0x180   : > { %v365_v9 = vpop.xlane.xlu1 %364  ;;  %v362_v10 = vpop.xlane.xlu0 %361 }
 0x181   : > { %v427_v11 = vadd.f32 1e-05, %v419_v8 }
 0x183   : > { %983 = vrsqrt.f32 %v427_v11 }
 0x184   : > { %v397_v12 = vpop.xlane.xlu1 %396  ;;  %v394_v13 = vpop.xlane.xlu0 %393 }
 0x185   : > { %v413_v14 = vadd.f32 %v397_v12, %v365_v9  ;;  %v412_v15 = vadd.f32 %v394_v13, %v362_v10 }
 0x187   : > { %v421_v18 = vmul.f32 0.0078125, %v413_v14  ;;  %v420_v19 = vmul.f32 0.0078125, %v412_v15  ;;  %v843_v14 = vld [vmem:[%s1574_s3] ss:$0 sm:$0xff] }
 0x188   : > { %v371_v30 = vpop.xlane.xlu1 %370  ;;  %v368_v31 = vpop.xlane.xlu0 %367 }
 0x189   : > { %v429_v32 = vadd.f32 1e-05, %v421_v18  ;;  %v428_v16 = vadd.f32 1e-05, %v420_v19 }
 0x18b   : > { %985 = vrsqrt.f32 %v429_v32 }
 0x18c   : > { %987 = vrsqrt.f32 %v428_v16  ;;  %v403_v20 = vpop.xlane.xlu1 %402  ;;  %v400_v17 = vpop.xlane.xlu0 %399 }
 0x18d   : > { %v982_v33 = vpop.eup %981  ;;  %v415_v34 = vadd.f32 %v403_v20, %v371_v30  ;;  %v414_v21 = vadd.f32 %v400_v17, %v368_v31 }
 0x18e   : > { %v454_v48 = vmul.f32 %v982_v33, %v1393_v39  ;;  %v442_v49 = vmul.f32 %v982_v33, %v1391_v38 }
 0x18f   : > { %v423_v35 = vmul.f32 0.0078125, %v415_v34  ;;  %v422_v36 = vmul.f32 0.0078125, %v414_v21 }
 0x190   : > { %v984_v37 = vpop.eup %983  ;;  %v377_v40 = vpop.xlane.xlu1 %376 }
 0x191   : > { %v374_v41 = vpop.xlane.xlu0 %373  ;;  %v431_v24 = vadd.f32 1e-05, %v423_v35  ;;  %v430_v50 = vadd.f32 1e-05, %v422_v36  ;;  %v455_v28 = vmul.f32 %v984_v37, %v1399_v46  ;;  %v443_v25 = vmul.f32 %v984_v37, %v1397_v45 }
 0x193   : > { %989 = vrsqrt.f32 %v431_v24  ;;  %v462_v29 = vpack.c.bf16 %v455_v28, %v454_v48  ;;  %v450_v51 = vpack.c.bf16 %v443_v25, %v442_v49 }
 0x194   : > { %991 = vrsqrt.f32 %v430_v50  ;;  %v409_v52 = vpop.xlane.xlu1 %408 }
 0x195   : > { %v406_v53 = vpop.xlane.xlu0 %405  ;;  %v417_v54 = vadd.f32 %v409_v52, %v377_v40  ;;  %876 = vmatprep.mubr.msk.bf16.mxu0 %vm265_vm0, %v462_v29  ;;  %892 = vmatprep.mubr.msk.bf16.mxu1 %vm265_vm0, %v450_v51 }
 0x196   : > { %v416_v55 = vadd.f32 %v406_v53, %v374_v41 }
 0x197   : > { %v425_v39 = vmul.f32 0.0078125, %v417_v54 }
 0x198   : > { %v424_v38 = vmul.f32 0.0078125, %v416_v55  ;;  %v986_v56 = vpop.eup %985 }
 0x199   : > { %v988_v57 = vpop.eup %987  ;;  %v433_v58 = vadd.f32 1e-05, %v425_v39  ;;  %v457_v45 = vmul.f32 %v986_v56, %v1415_v63  ;;  %v445_v59 = vmul.f32 %v986_v56, %v1412_v62 }
 0x19a   : > { %v432_v46 = vadd.f32 1e-05, %v424_v38  ;;  %v456_v60 = vmul.f32 %v988_v57, %v1421_v1  ;;  %v444_v61 = vmul.f32 %v988_v57, %v1418_v0 }
 0x19b   : > { %993 = vrsqrt.f32 %v433_v58 }
 0x19c   : > { %995 = vrsqrt.f32 %v432_v46  ;;  %v463_v2 = vpack.c.bf16 %v457_v45, %v456_v60  ;;  %v451_v3 = vpack.c.bf16 %v445_v59, %v444_v61 }
 0x19e   : > { %877 = vmatmul.mubr.msk.bf16.vlgmr.msra.gmra.mxu0 %vm265_vm0, %v463_v2  ;;  %893 = vmatmul.mubr.msk.bf16.vlgmr.msra.gmra.mxu1 %vm265_vm0, %v451_v3 }
 0x1a0   : > { %v990_v4 = vpop.eup %989 }
 0x1a1   : > { %v992_v5 = vpop.eup %991  ;;  %v459_v6 = vmul.f32 %v990_v4, %v1439_v23  ;;  %v447_v63 = vmul.f32 %v990_v4, %v1436_v22 }
 0x1a2   : > { %v458_v62 = vmul.f32 %v992_v5, %v1445_v27  ;;  %v446_v1 = vmul.f32 %v992_v5, %v1442_v26 }
 0x1a4   : > { %v464_v0 = vpack.c.bf16 %v459_v6, %v458_v62  ;;  %v452_v7 = vpack.c.bf16 %v447_v63, %v446_v1 }
 0x1a6   : > { %880 = vmatprep.mubr.msk.bf16.mxu0 %vm265_vm0, %v464_v0  ;;  %896 = vmatprep.mubr.msk.bf16.mxu1 %vm265_vm0, %v452_v7 }
 0x1a8   : > { %v994_v8 = vpop.eup %993 }
 0x1a9   : > { %v996_v9 = vpop.eup %995  ;;  %v461_v10 = vmul.f32 %v994_v8, %v1463_v43  ;;  %v449_v11 = vmul.f32 %v994_v8, %v1460_v42 }
 0x1aa   : > { %v460_v23 = vmul.f32 %v996_v9, %v1469_v47  ;;  %v448_v22 = vmul.f32 %v996_v9, %v1466_v44 }
 0x1ac   : > { %v465_v27 = vpack.c.bf16 %v461_v10, %v460_v23  ;;  %v453_v12 = vpack.c.bf16 %v449_v11, %v448_v22 }
 0x1ae   : > { %881 = vmatmul.mubr.msk.bf16.gmra.mxu0 %vm265_vm0, %v465_v27  ;;  %897 = vmatmul.mubr.msk.bf16.gmra.mxu1 %vm265_vm0, %v453_v12 }
 0x25e   : > { %v878_v26 = vpop.f32.mrf.mxu0  ;;  %v894_v13 = vpop.f32.mrf.mxu1 }
 0x25f   : > { %v662_v43 = vadd.f32 %v894_v13, %v878_v26 }
 0x260   : > { %v552_v15 = vpop.f32.mrf.mxu0  ;;  %v653_v42 = vpop.f32.mrf.mxu1 }
 0x261   : > { %v693_v18 = vadd.f32 %v843_v14, %v662_v43  ;;  %v654_v47 = vadd.f32 %v653_v42, %v552_v15 }
 0x262   : > { %v879_v19 = vpop.f32.mrf.mxu0  ;;  %v895_v44 = vpop.f32.mrf.mxu1 }
 0x263   : > { %701 = vst [vmem:[%s1511_s5 + $0x10] sm:$0xff] %v693_v18  ;;  %v691_v30 = vadd.f32 %v843_v14, %v654_v47  ;;  %v665_v31 = vadd.f32 %v895_v44, %v879_v19 }
 0x264   : > { %v555_v32 = vpop.f32.mrf.mxu0  ;;  %v656_v16 = vpop.f32.mrf.mxu1 }
 0x265   : > { %699 = vst [vmem:[%s1511_s5] sm:$0xff] %v691_v30  ;;  %v694_v20 = vadd.f32 %v843_v14, %v665_v31  ;;  %v657_v17 = vadd.f32 %v656_v16, %v555_v32 }
 0x267   : > { %702 = vst [vmem:[%s1511_s5 + $0x18] sm:$0xff] %v694_v20  ;;  %v692_v33 = vadd.f32 %v843_v14, %v657_v17 }
 0x269   : > { %700 = vst [vmem:[%s1511_s5 + $0x8] sm:$0xff] %v692_v33 }
 0x26e   : > { %v882_v34 = vpop.f32.mrf.mxu0  ;;  %v898_v21 = vpop.f32.mrf.mxu1 }
 0x26f   : > { %v678_v35 = vadd.f32 %v898_v21, %v882_v34 }
 0x270   : > { %v568_v36 = vpop.f32.mrf.mxu0  ;;  %v669_v37 = vpop.f32.mrf.mxu1 }
 0x271   : > { %v697_v40 = vadd.f32 %v843_v14, %v678_v35  ;;  %v670_v41 = vadd.f32 %v669_v37, %v568_v36 }
 0x272   : > { %v883_v48 = vpop.f32.mrf.mxu0  ;;  %v899_v49 = vpop.f32.mrf.mxu1 }
 0x273   : > { %705 = vst [vmem:[%s1511_s5 + $0x30] sm:$0xff] %v697_v40  ;;  %v695_v24 = vadd.f32 %v843_v14, %v670_v41  ;;  %v681_v50 = vadd.f32 %v899_v49, %v883_v48 }
 0x274   : > { %v571_v28 = vpop.f32.mrf.mxu0  ;;  %v672_v25 = vpop.f32.mrf.mxu1 }
 0x275   : > { %703 = vst [vmem:[%s1511_s5 + $0x20] sm:$0xff] %v695_v24  ;;  %v698_v29 = vadd.f32 %v843_v14, %v681_v50  ;;  %v673_v51 = vadd.f32 %v672_v25, %v571_v28 }
 0x277   : > { %706 = vst [vmem:[%s1511_s5 + $0x38] sm:$0xff] %v698_v29  ;;  %v696_v52 = vadd.f32 %v843_v14, %v673_v51 }
 0x279   : > { %704 = vst [vmem:[%s1511_s5 + $0x28] sm:$0xff] %v696_v52 }
 0x27a   : > { %1090 = shalt.err (!%p1087_p9)
}
 0x27b   : > { %s1091_s10 = scalar_lea.hbm %s1526_s26, 1024  ;;  %s1095_s21 = scalar_lea.hbm %s1575_s4, 2048 }
 0x27c   : > { %p1092_p13 = scmp.ne.s32.totalorder %s1526_s26, %s1091_s10  ;;  %p1096_p4 = scmp.lt.s32.totalorder %s1526_s26, %s1575_s4 }
 0x27d   : > { %p1097_p8 = scmp.lt.s32.totalorder %s1095_s21, %s1091_s10 }
 0x27e   : > { %p1093_p5 = pnand %p1092_p13, %p1591_p10 }
 0x27f   : > { %p1098_p3 = por %p1097_p8, %p1096_p4 }
 0x280   : > { %p1094_p0 = pneg %p1093_p5 }
 0x282   : > { %p1099_p11 = pnand %p1098_p3, %p1094_p0 }
 0x284   : > { %1102 = shalt.err (!%p1099_p11)
}
 0x285   : > { %s1155_s5 = smov 128   ;;  %s1156_s7 = smov 8  }
 0x286   : > { %910 = dma.vmem_to_hbm [thread:$0]  (%p1591_p10), %s1520_s6, 1024, %s1526_s26, %s708_s27, %s1155_s5, %s1155_s5, %s1156_s7  }
 0x287 PF: > { %s736_s25 = sand.u32 1, %s1133_s15   ;;  %p1592_p1 = scmp.ne.s32.totalorder %s1581_s22, 0 }
 0x288   : > { %p1593_p2 = scmp.ge.s32.totalorder %s1145_s18, 2  ;;  %s737_s24 = scalar_lea.sflag [#allocation4], %s736_s25 }
 0x28a   : > { %p924_p6 = pnand %p1593_p2, %p1592_p1 }
 0x28c   : > { %p925_p12 = pneg %p924_p6 }
 0x28e   : > { %1128 = dma.done.wait (%p925_p12), %s737_s24, 1024  }
 0x28f   : > { %1130 = vsyncadd (%p925_p12), %s737_s24, 4294966272  ;;  %p18_p7 = scmp.ge.s32.totalorder %s1254_s11, 4   ;;  %s1594_s15 = smov %s1137_s16 }
 0x290   : > { %s1595_s16 = smov %s1141_s17  ;;  %s1596_s17 = smov %s1270_s20 }
 0x291   : > { %s1597_s18 = smov %s1254_s11  ;;  %20 = sbr.rel (!%p18_p7) target bundleno = 6 (0x6), region = 89 }
 0x296   :  { %742 = vsyncpa [#allocation3], 1 }
 0x297   :  { %744 = vsyncpa [#allocation3 + $0x1], 1 }
 0x298   :  { %745 = vsyncpa [#allocation6], 1 }
 0x299   :  { %746 = vsyncpa [#allocation4], 1 }
 0x29a   :  { %748 = vsyncpa [#allocation4 + $0x1], 1 }

</bundles_post_ra>
